<compile_context>
chip_gen: v7x
topology: tpu7x:2x2x1
jax: 0.10.0
libtpu: 0.0.40
codegen_flags: <defaults>
</compile_context>

<pallas_src>
import functools

import jax
import jax.numpy as jnp
from jax import lax
from jax.experimental import pallas as pl
from jax.experimental.pallas import tpu as pltpu

LANE = 128
_VMEM_LIMIT = 48 * 1024 * 1024


# ---------------------------------------------------------------------------
# helpers
# ---------------------------------------------------------------------------
def _round_up(x, m):
    return (x + m - 1) // m * m


def _softplus(x):
    # numerically stable log(1 + exp(x)) == torch.nn.Softplus()
    return jnp.maximum(x, 0.0) + jnp.log1p(jnp.exp(-jnp.abs(x)))


def _sigmoid(x):
    # exp on the EUP + approximate EUP reciprocal keeps gating off the VALU.
    return pl.reciprocal(1.0 + jnp.exp(-x), approx=True)


def _vmem_specs(n):
    return [pl.BlockSpec(memory_space=pltpu.MemorySpace.VMEM) for _ in range(n)]


_VMEM_OUT = pl.BlockSpec(memory_space=pltpu.MemorySpace.VMEM)


def _pad2(x, rows, cols):
    return jnp.pad(x, ((0, rows - x.shape[0]), (0, cols - x.shape[1])))


# ---------------------------------------------------------------------------
# kernels
# ---------------------------------------------------------------------------
def _embed_kernel(x_ref, w_ref, b_ref, o_ref):
    o_ref[...] = (
        jnp.dot(x_ref[...], w_ref[...], preferred_element_type=jnp.float32)
        + b_ref[...]
    )


def _conv_kernel(atom_ref, anbr_ref, nbr_ref,
                 wsf_ref, wnf_ref, wbf_ref, bf_ref,
                 wsc_ref, wnc_ref, wbc_ref, bc_ref,
                 g1f_ref, be1f_ref, g1c_ref, be1c_ref,
                 g2_ref, be2_ref,
                 o_ref, *, n_atoms, m_nbrs):
    """One fused CGCNN ConvLayer.

    atom : (N, Ap)   anbr/nbr : (E, Ap)/(E, Bp) in neighbor-major edge order,
    i.e. edge row j*N + i == (atom i, neighbor slot j).  With that layout the
    "self" gather and the scatter_add both disappear (broadcast / segment sum).
    """
    n = n_atoms
    e_total = float(n_atoms * m_nbrs)
    ap = o_ref.shape[1]

    atom = atom_ref[...]                                         # (N, Ap)
    wnf = wnf_ref[...]
    wbf = wbf_ref[...]
    wnc = wnc_ref[...]
    wbc = wbc_ref[...]

    # self contribution: one (N, Ap) matmul reused for all M neighbor slots
    sf = jnp.dot(atom, wsf_ref[...], preferred_element_type=jnp.float32) + bf_ref[...]
    sc = jnp.dot(atom, wsc_ref[...], preferred_element_type=jnp.float32) + bc_ref[...]

    # pass 1: fc_full per neighbor slot + BN1 batch statistics (sum / sumsq)
    zf_blocks = []
    zc_blocks = []
    sum_f = jnp.zeros((1, ap), jnp.float32)
    sq_f = jnp.zeros((1, ap), jnp.float32)
    sum_c = jnp.zeros((1, ap), jnp.float32)
    sq_c = jnp.zeros((1, ap), jnp.float32)
    for j in range(m_nbrs):
        a_j = anbr_ref[pl.ds(j * n, n), :]                       # (N, Ap)
        b_j = nbr_ref[pl.ds(j * n, n), :]                        # (N, Bp)
        zf_j = (sf
                + jnp.dot(a_j, wnf, preferred_element_type=jnp.float32)
                + jnp.dot(b_j, wbf, preferred_element_type=jnp.float32))
        zc_j = (sc
                + jnp.dot(a_j, wnc, preferred_element_type=jnp.float32)
                + jnp.dot(b_j, wbc, preferred_element_type=jnp.float32))
        zf_blocks.append(zf_j)
        zc_blocks.append(zc_j)
        sum_f = sum_f + jnp.sum(zf_j, axis=0, keepdims=True)
        sq_f = sq_f + jnp.sum(zf_j * zf_j, axis=0, keepdims=True)
        sum_c = sum_c + jnp.sum(zc_j, axis=0, keepdims=True)
        sq_c = sq_c + jnp.sum(zc_j * zc_j, axis=0, keepdims=True)

    # BN1 (training mode: batch mean, biased variance), folded to scale+shift
    eps = 1e-5
    mean_f = sum_f / e_total
    var_f = jnp.maximum(sq_f / e_total - mean_f * mean_f, 0.0)
    scale_f = lax.rsqrt(var_f + eps) * g1f_ref[...]
    shift_f = be1f_ref[...] - mean_f * scale_f
    mean_c = sum_c / e_total
    var_c = jnp.maximum(sq_c / e_total - mean_c * mean_c, 0.0)
    scale_c = lax.rsqrt(var_c + eps) * g1c_ref[...]
    shift_c = be1c_ref[...] - mean_c * scale_c

    # pass 2: gated message + SumPooling (segment sum over self_fea_idx)
    summed = jnp.zeros_like(atom)
    for j in range(m_nbrs):
        filt = _sigmoid(zf_blocks[j] * scale_f + shift_f)
        core = _softplus(zc_blocks[j] * scale_c + shift_c)
        summed = summed + filt * core                            # (N, Ap)

    # BN2 (training mode) + residual + softplus
    ms = jnp.mean(summed, axis=0, keepdims=True)
    vs = jnp.mean((summed - ms) * (summed - ms), axis=0, keepdims=True)
    summed = (summed - ms) * lax.rsqrt(vs + eps) * g2_ref[...] + be2_ref[...]
    o_ref[...] = _softplus(atom + summed)


def _pool_head_kernel(atom_ref, cidx_ref, counts_ref, w1_ref, b1_ref,
                      w2_ref, b2_ref, o_ref, *, n_crystals):
    """MeanPooling + conv_to_fc_softplus -> conv_to_fc -> softplus -> fc_out."""
    atom = atom_ref[...]                                         # (N, Ap)
    cidx = cidx_ref[...]                                         # (N, 1) int32
    n = atom.shape[0]
    # (N, N0) one-hot is tiny (few crystals); counts are precomputed outside,
    # so no extra MXU pass for them.
    oh = (cidx == lax.broadcasted_iota(jnp.int32, (n, n_crystals), 1))
    oh = oh.astype(jnp.float32)
    pooled = lax.dot_general(oh, atom, (((0,), (0,)), ((), ())),
                             preferred_element_type=jnp.float32)  # (N0, Ap)
    pooled = pooled / jnp.maximum(counts_ref[...], 1.0)
    x = _softplus(pooled)
    h = _softplus(
        jnp.dot(x, w1_ref[...], preferred_element_type=jnp.float32) + b1_ref[...]
    )
    o_ref[...] = (
        jnp.dot(h, w2_ref[...], preferred_element_type=jnp.float32) + b2_ref[...]
    )


# ---------------------------------------------------------------------------
# wrappers (pallas_call glue)
# ---------------------------------------------------------------------------
def embedding(x, w, b):
    n, fp = x.shape
    ap = w.shape[1]
    tile = min(512, _round_up(n, 8))
    grid = (pl.cdiv(n, tile),)
    return pl.pallas_call(
        _embed_kernel,
        out_shape=jax.ShapeDtypeStruct((n, ap), jnp.float32),
        grid_spec=pltpu.PrefetchScalarGridSpec(
            num_scalar_prefetch=0,
            grid=grid,
            in_specs=[pl.BlockSpec((tile, fp), lambda i: (i, 0)),
                      pl.BlockSpec((fp, ap), lambda i: (0, 0)),
                      pl.BlockSpec((1, ap), lambda i: (0, 0))],
            out_specs=pl.BlockSpec((tile, ap), lambda i: (i, 0)),
        ),
        compiler_params=pltpu.CompilerParams(
            dimension_semantics=("parallel",),
            vmem_limit_bytes=_VMEM_LIMIT),
    )(x, w, b)


def conv_layer(atom, atom_nbr, nbr_e, layer_params, *, n_atoms, m_nbrs):
    n, ap = atom.shape
    e, bp = nbr_e.shape
    kern = functools.partial(_conv_kernel, n_atoms=n_atoms, m_nbrs=m_nbrs)
    ce = pl.CostEstimate(
        flops=int(2 * (2 * n * ap * ap + 2 * e * ap * ap + 2 * e * bp * ap)),
        transcendentals=int(3 * e * ap + 2 * n * ap),
        bytes_accessed=int(4 * (2 * n * ap + e * ap + e * bp
                                + 4 * ap * ap + 2 * bp * ap)),
    )
    return pl.pallas_call(
        kern,
        out_shape=jax.ShapeDtypeStruct((n, ap), jnp.float32),
        in_specs=_vmem_specs(3 + len(layer_params)),
        out_specs=_VMEM_OUT,
        compiler_params=pltpu.CompilerParams(vmem_limit_bytes=_VMEM_LIMIT),
        cost_estimate=ce,
    )(atom, atom_nbr, nbr_e, *layer_params)


def pool_head(atom, cidx2d, counts, w1, b1, w2, b2, *, n_crystals):
    kern = functools.partial(_pool_head_kernel, n_crystals=n_crystals)
    return pl.pallas_call(
        kern,
        out_shape=jax.ShapeDtypeStruct((n_crystals, w2.shape[1]), jnp.float32),
        in_specs=_vmem_specs(7),
        out_specs=_VMEM_OUT,
        compiler_params=pltpu.CompilerParams(vmem_limit_bytes=_VMEM_LIMIT),
    )(atom, cidx2d, counts, w1, b1, w2, b2)


def crystal_graph_conv_net(params, atom_fea, nbr_fea, nbr_fea_idx,
                           crystal_atom_idx, n_crystals):
    """Forward pass.

    atom_fea         : (N, orig_atom_fea_len)
    nbr_fea          : (N, M, nbr_fea_len)
    nbr_fea_idx      : (N, M) int  (neighbor atom indices)
    crystal_atom_idx : (N,)   int  (crystal id of each atom)

    Equivalent to the edge-list torch forward with
    self_fea_idx = repeat(arange(N), M) and nbr tensors flattened row-major
    (the canonical CGCNN data layout).
    """
    n_atoms, m_nbrs, b_len = nbr_fea.shape
    f_len = atom_fea.shape[1]
    a_len = params["convs"][0]["wsf"].shape[0]
    h_len = params["fc1_w"].shape[1]

    fp = _round_up(f_len, LANE)
    ap = _round_up(a_len, LANE)
    bp = _round_up(b_len, LANE)
    hp = _round_up(h_len, LANE)
    op = LANE                                  # padded head-output width

    # ---- pad all feature widths to multiples of 128 lanes (zero padding) ----
    x0 = _pad2(atom_fea.astype(jnp.float32), n_atoms, fp)
    emb_w = _pad2(params["emb_w"], fp, ap)
    emb_b = _pad2(params["emb_b"], 1, ap)

    convs_p = []
    for lp in params["convs"]:
        convs_p.append((
            _pad2(lp["wsf"], ap, ap), _pad2(lp["wnf"], ap, ap),
            _pad2(lp["wbf"], bp, ap), _pad2(lp["bf"], 1, ap),
            _pad2(lp["wsc"], ap, ap), _pad2(lp["wnc"], ap, ap),
            _pad2(lp["wbc"], bp, ap), _pad2(lp["bc"], 1, ap),
            _pad2(lp["g1f"], 1, ap), _pad2(lp["be1f"], 1, ap),
            _pad2(lp["g1c"], 1, ap), _pad2(lp["be1c"], 1, ap),
            _pad2(lp["g2"], 1, ap), _pad2(lp["be2"], 1, ap),
        ))

    fc1_w = _pad2(params["fc1_w"], ap, hp)
    fc1_b = _pad2(params["fc1_b"], 1, hp)
    fc2_w = _pad2(params["fc2_w"], hp, op)
    fc2_b = _pad2(params["fc2_b"], 1, op)

    # ---- neighbor-major edge layout: row j*N + i == (atom i, slot j) --------
    nbr_pad = jnp.pad(nbr_fea.astype(jnp.float32),
                      ((0, 0), (0, 0), (0, bp - b_len)))
    nbr_e = nbr_pad.transpose(1, 0, 2).reshape(m_nbrs * n_atoms, bp)
    nidx_e = nbr_fea_idx.astype(jnp.int32).T.reshape(-1)

    cidx2d = crystal_atom_idx.astype(jnp.int32).reshape(-1, 1)
    counts = jnp.zeros((n_crystals, 1), jnp.float32).at[crystal_atom_idx].add(1.0)

    # ---- network ------------------------------------------------------------
    x = embedding(x0, emb_w, emb_b)                              # (N, Ap)
    for lp in convs_p:
        # O(E*A) gather of neighbor rows (XLA take between layer kernels).
        atom_nbr = jnp.take(x, nidx_e, axis=0)                   # (E, Ap)
        x = conv_layer(x, atom_nbr, nbr_e, lp,
                       n_atoms=n_atoms, m_nbrs=m_nbrs)
    crys = pool_head(x, cidx2d, counts, fc1_w, fc1_b, fc2_w, fc2_b,
                     n_crystals=n_crystals)                      # (N0, 128)
    return crys[:, :1]                                           # (N0, 1)


# ---------------------------------------------------------------------------
# deterministic parameter init (shapes per CrystalGraphConvNet.__init__)
# ---------------------------------------------------------------------------
def _linear_init(key, fan_in, fan_out):
    k1, k2 = jax.random.split(key)
    bound = 1.0 / (fan_in ** 0.5)
    w = jax.random.uniform(k1, (fan_in, fan_out), jnp.float32, -bound, bound)
    b = jax.random.uniform(k2, (1, fan_out), jnp.float32, -bound, bound)
    return w, b


def init_params(key, orig_fea, nbr_fea_len, atom_fea_len, h_fea_len, n_conv):
    a, b = atom_fea_len, nbr_fea_len
    keys = jax.random.split(key, 3 + n_conv)
    emb_w, emb_b = _linear_init(keys[0], orig_fea, a)

    convs = []
    for i in range(n_conv):
        w_full, b_full = _linear_init(keys[1 + i], 2 * a + b, 2 * a)
        # fc_full weight rows = [self | nbr | bond], cols = [filter | core]
        convs.append(dict(
            wsf=w_full[:a, :a], wsc=w_full[:a, a:],
            wnf=w_full[a:2 * a, :a], wnc=w_full[a:2 * a, a:],
            wbf=w_full[2 * a:, :a], wbc=w_full[2 * a:, a:],
            bf=b_full[:, :a], bc=b_full[:, a:],
            g1f=jnp.ones((1, a), jnp.float32), be1f=jnp.zeros((1, a), jnp.float32),
            g1c=jnp.ones((1, a), jnp.float32), be1c=jnp.zeros((1, a), jnp.float32),
            g2=jnp.ones((1, a), jnp.float32), be2=jnp.zeros((1, a), jnp.float32),
        ))

    fc1_w, fc1_b = _linear_init(keys[1 + n_conv], a, h_fea_len)
    fc2_w, fc2_b = _linear_init(keys[2 + n_conv], h_fea_len, 1)
    return dict(emb_w=emb_w, emb_b=emb_b, convs=convs,
                fc1_w=fc1_w, fc1_b=fc1_b, fc2_w=fc2_w, fc2_b=fc2_b)


# ---------------------------------------------------------------------------
# main
# ---------------------------------------------------------------------------
if __name__ == "__main__":
    # small synthetic graph batch
    N = 16              # total atoms in the batch
    M = 4               # neighbors per atom  -> E = N*M edges
    N0 = 2              # crystals in the batch
    orig_atom_fea_len = 16
    nbr_fea_len = 16
    atom_fea_len = 64   # module default
    h_fea_len = 128     # module default
    n_conv = 3

    key = jax.random.PRNGKey(0)
    k_data, k_params = jax.random.split(key)
    kd = jax.random.split(k_data, 3)

    atom_fea = jax.random.normal(kd[0], (N, orig_atom_fea_len), jnp.float32)
    nbr_fea = jax.random.normal(kd[1], (N, M, nbr_fea_len), jnp.float32)
    nbr_fea_idx = jax.random.randint(kd[2], (N, M), 0, N, dtype=jnp.int32)
    crystal_atom_idx = jnp.repeat(jnp.arange(N0, dtype=jnp.int32), N // N0)

    params = init_params(k_params, orig_atom_fea_len, nbr_fea_len,
                         atom_fea_len, h_fea_len, n_conv)

    out = crystal_graph_conv_net(params, atom_fea, nbr_fea, nbr_fea_idx,
                                 crystal_atom_idx, N0)
    out = jax.block_until_ready(out)
    assert out.shape == (N0, 1) and out.dtype == jnp.float32
    assert bool(jnp.all(jnp.isfinite(out)))
    print("KERNEL_OK")
</pallas_src>

<mosaic_0001>
module attributes {stable_mosaic.version = 11 : i64} {
  func.func @_embed_kernel(%arg0: i32, %arg1: memref<16x128xf32, #tpu.memory_space<vmem>>, %arg2: memref<128x128xf32, #tpu.memory_space<vmem>>, %arg3: memref<1x128xf32, #tpu.memory_space<vmem>>, %arg4: memref<16x128xf32, #tpu.memory_space<vmem>>) attributes {dimension_semantics = [#tpu.dimension_semantics<parallel>], iteration_bounds = array<i64: 1>, scalar_prefetch = 0 : i64, scratch_operands = 0 : i64, tpu.core_type = #tpu.core_type<tc>, window_params = [{transform_indices = @transform_0, window_bounds = array<i64: 16, 128>}, {pipeline_mode = #tpu.pipeline_mode<synchronous>, transform_indices = @transform_1, window_bounds = array<i64: 128, 128>}, {pipeline_mode = #tpu.pipeline_mode<synchronous>, transform_indices = @transform_2, window_bounds = array<i64: 1, 128>}, {transform_indices = @transform_3, window_bounds = array<i64: 16, 128>}]} {
    %c0 = arith.constant 0 : index
    %c0_0 = arith.constant 0 : index
    %0 = vector.load %arg1[%c0, %c0_0] : memref<16x128xf32, #tpu.memory_space<vmem>>, vector<16x128xf32>
    %c0_1 = arith.constant 0 : index
    %c0_2 = arith.constant 0 : index
    %1 = vector.load %arg2[%c0_1, %c0_2] : memref<128x128xf32, #tpu.memory_space<vmem>>, vector<128x128xf32>
    %cst = arith.constant dense<0.000000e+00> : vector<16x128xf32>
    %2 = tpu.matmul %0, %1, %cst {dimension_numbers = #tpu.dot_dimension_numbers<[1], [0], [0], [1], [0, 0, 1, 1], [], []>} : vector<16x128xf32>, vector<128x128xf32>, vector<16x128xf32> -> vector<16x128xf32>
    %c0_3 = arith.constant 0 : index
    %c0_4 = arith.constant 0 : index
    %3 = vector.load %arg3[%c0_3, %c0_4] : memref<1x128xf32, #tpu.memory_space<vmem>>, vector<1x128xf32>
    %4 = vector.broadcast %3 : vector<1x128xf32> to vector<16x128xf32>
    %5 = arith.addf %2, %4 : vector<16x128xf32>
    %c0_5 = arith.constant 0 : index
    %c0_6 = arith.constant 0 : index
    %6 = vector.load %arg4[%c0_5, %c0_6] : memref<16x128xf32, #tpu.memory_space<vmem>>, vector<16x128xf32>
    tpu.vector_store %arg4[%c0_5, %c0_6], %5 {strides = array<i32>} : memref<16x128xf32, #tpu.memory_space<vmem>>, vector<16x128xf32>,
    return
  }
  func.func @transform_0(%arg0: i32) -> (i32, i32) {
    %c0_i32 = arith.constant 0 : i32
    %c0_i32_0 = arith.constant 0 : i32
    return %arg0, %c0_i32 : i32, i32
  }
  func.func @transform_1(%arg0: i32) -> (i32, i32) {
    %c0_i32 = arith.constant 0 : i32
    %c0_i32_0 = arith.constant 0 : i32
    %c0_i32_1 = arith.constant 0 : i32
    return %c0_i32, %c0_i32_0 : i32, i32
  }
  func.func @transform_2(%arg0: i32) -> (i32, i32) {
    %c0_i32 = arith.constant 0 : i32
    %c0_i32_0 = arith.constant 0 : i32
    %c0_i32_1 = arith.constant 0 : i32
    return %c0_i32, %c0_i32_0 : i32, i32
  }
  func.func @transform_3(%arg0: i32) -> (i32, i32) {
    %c0_i32 = arith.constant 0 : i32
    %c0_i32_0 = arith.constant 0 : i32
    return %arg0, %c0_i32 : i32, i32
  }
}

</mosaic_0001>

<bundles_post_ra>
// kernel: tpu_custom_call.1
= control target key start
LH: loop header
LB: loop body
LE: loop exit
PB: predicated region body
PF: predicated region fallthrough
CT: control target
= control target key end

     0   :  { %8 = vsyncpa [#allocation3], 0  ;;  %s399_s0 = inlined_call_operand.hbm [shape: f32[16,128], index: 0, kind: input, shape index: {}]   ;;  %s400_s1 = inlined_call_operand.hbm [shape: f32[128,128], index: 1, kind: input, shape index: {}]   ;;  %s401_s2 = inlined_call_operand.vmem [shape: f32[1,128], index: 2, kind: input, shape index: {}]   ;;  %s402_s3 = inlined_call_operand.hbm [shape: f32[16,128], index: 3, kind: output, shape index: {}]  }
   0x1   :  { %9 = vsyncpa [#allocation6], 0 }
   0x2   :  { %10 = vsyncpa [#allocation4], 0  ;;  %s326_s12 = smov [#allocation2]   ;;  %s254_s16 = scalar_lea.hbm %s399_s0, 256 }
   0x3   :  { %s16_s13 = sshll.u32 %s326_s12, 4  ;;  %p255_p0 = scmp.ne.s32.totalorder %s399_s0, %s254_s16  ;;  %s17_s13 = int_to_ptr.vmem [resolvable:$true] %s16_s13 }
   0x4   :  { %p258_p1 = scmp.lt.u32.totalorder %s254_s16, %s399_s0 }
   0x6   :  { %p260_p2 = pnand %p258_p1, %p255_p0 }
   0x8   :  { %263 = shalt.err (!%p260_p2)
}
   0x9   :  { %s264_s21 = scalar_lea.vmem %s17_s13, 256  ;;  %p269_p4 = scmp.lt.s32.totalorder %s17_s13, %s17_s13 }
   0xa   :  { %p265_p3 = scmp.ne.s32.totalorder %s17_s13, %s264_s21  ;;  %p270_p5 = scmp.lt.s32.totalorder %s264_s21, %s264_s21 }
   0xc   :  { %p271_p6 = por %p270_p5, %p269_p4 }
   0xe   :  { %p272_p7 = pnand %p271_p6, %p265_p3 }
  0x10   :  { %275 = shalt.err (!%p272_p7)
}
  0x11   :  { %s327_s22 = smov 128   ;;  %s328_s23 = smov 8  }
  0x12   :  { %22 = dma.hbm_to_vmem [thread:$0]  %s399_s0, 256, %s17_s13, [#allocation3], %s327_s22, %s327_s22, %s328_s23  }
  0x13   :  { %s329_s26 = smov [#allocation5]   ;;  %s276_s30 = scalar_lea.hbm %s400_s1, 2048 }
  0x14   :  { %s28_s27 = sshll.u32 %s329_s26, 4  ;;  %p277_p8 = scmp.ne.s32.totalorder %s400_s1, %s276_s30  ;;  %s29_s27 = int_to_ptr.vmem [resolvable:$true] %s28_s27 }
  0x15   :  { %p280_p9 = scmp.lt.u32.totalorder %s276_s30, %s400_s1 }
  0x17   :  { %p282_p10 = pnand %p280_p9, %p277_p8 }
  0x19   :  { %285 = shalt.err (!%p282_p10)
}
  0x1a   :  { %s286_s8 = scalar_lea.vmem %s29_s27, 2048  ;;  %p291_p12 = scmp.lt.s32.totalorder %s29_s27, %s29_s27 }
  0x1b   :  { %p287_p11 = scmp.ne.s32.totalorder %s29_s27, %s286_s8  ;;  %p292_p13 = scmp.lt.s32.totalorder %s286_s8, %s286_s8 }
  0x1d   :  { %p293_p0 = por %p292_p13, %p291_p12 }
  0x1f   :  { %p294_p1 = pnand %p293_p0, %p287_p11 }
  0x21   :  { %297 = shalt.err (!%p294_p1)
}
  0x22   :  { %34 = dma.hbm_to_vmem [thread:$0]  %s400_s1, 2048, %s29_s27, [#allocation6], %s327_s22, %s327_s22, %s328_s23  }
  0x23   :  { %320 = dma.done.wait [#allocation3], 256  }
  0x24   :  { %321 = vsyncadd [#allocation3], 4294967040 }
  0x25   :  { %322 = dma.done.wait [#allocation6], 2048  }
  0x26   :  { %323 = vsyncadd [#allocation6], 4294965248  ;;  %v45_v0 = vld [vmem:[#allocation5] sm:$0xff]  ;;  %v46_v1 = vld [vmem:[#allocation5 + $0x8] sm:$0xff]  ;;  %s330_s11 = smov [#allocation7]  }
  0x27   :  { %v47_v2 = vld [vmem:[#allocation5 + $0x10] sm:$0xff]  ;;  %v217_v3 = vpack.c.bf16 %v46_v1, %v45_v0  ;;  %v48_v4 = vld [vmem:[#allocation5 + $0x18] sm:$0xff]  ;;  %v49_v6 = vld [vmem:[#allocation5 + $0x20] sm:$0xff]  ;;  %s150_s12 = sshll.u32 %s330_s11, 4  ;;  %s151_s12 = int_to_ptr.vmem [resolvable:$true] %s150_s12 }
  0x28   :  { %v221_v5 = vpack.c.bf16 %v48_v4, %v47_v2  ;;  %v50_v7 = vld [vmem:[#allocation5 + $0x28] sm:$0xff]  ;;  %v43_v9 = vld [vmem:[#allocation2] sm:$0xff]  ;;  %v52_v11 = vld [vmem:[#allocation5 + $0x38] sm:$0xff]  ;;  %s298_s13 = scalar_lea.vmem %s151_s12, 256  ;;  %p303_p3 = scmp.lt.s32.totalorder %s151_s12, %s151_s12 }
  0x29   :  { %218 = vmatprep.subr.bf16.mxu0 %v217_v3  ;;  %v225_v8 = vpack.c.bf16 %v50_v7, %v49_v6  ;;  %v51_v10 = vld [vmem:[#allocation5 + $0x30] sm:$0xff]  ;;  %214 = vmatprep.mubr.f32.mxu0 %v43_v9  ;;  %v53_v13 = vld [vmem:[#allocation5 + $0x40] sm:$0xff]  ;;  %v54_v14 = vld [vmem:[#allocation5 + $0x48] sm:$0xff]  ;;  %p299_p2 = scmp.ne.s32.totalorder %s151_s12, %s298_s13  ;;  %p304_p4 = scmp.lt.s32.totalorder %s298_s13, %s298_s13 }
  0x2a   :  { %220 = vmatpush3.bf16.msra.mxu0 %v217_v3  ;;  %v229_v12 = vpack.c.bf16 %v52_v11, %v51_v10  ;;  %v233_v15 = vpack.c.bf16 %v54_v14, %v53_v13  ;;  %v55_v16 = vld [vmem:[#allocation5 + $0x50] sm:$0xff]  ;;  %v56_v17 = vld [vmem:[#allocation5 + $0x58] sm:$0xff]  ;;  %v57_v19 = vld [vmem:[#allocation5 + $0x60] sm:$0xff] }
  0x2b   :  { %222 = vmatprep.subr.bf16.mxu0 %v221_v5  ;;  %v237_v18 = vpack.c.bf16 %v56_v17, %v55_v16  ;;  %v58_v20 = vld [vmem:[#allocation5 + $0x68] sm:$0xff]  ;;  %v59_v22 = vld [vmem:[#allocation5 + $0x70] sm:$0xff]  ;;  %v60_v23 = vld [vmem:[#allocation5 + $0x78] sm:$0xff]  ;;  %p305_p5 = por %p304_p4, %p303_p3 }
  0x2c   :  { %v241_v21 = vpack.c.bf16 %v58_v20, %v57_v19  ;;  %v245_v24 = vpack.c.bf16 %v60_v23, %v59_v22  ;;  %v44_v25 = vld [vmem:[#allocation2 + $0x8] sm:$0xff]  ;;  %v163_v26 = vld [vmem:[%s401_s2] ss:$0 sm:$0xff] }
  0x2d   :  { %p306_p6 = pnand %p305_p5, %p299_p2 }
  0x2e   :  { %224 = vmatpush3.bf16.msra.mxu0 %v221_v5 }
  0x2f   :  { %226 = vmatprep.subr.bf16.mxu0 %v225_v8 }
  0x32   :  { %228 = vmatpush3.bf16.msra.mxu0 %v225_v8 }
  0x33   :  { %230 = vmatprep.subr.bf16.mxu0 %v229_v12 }
  0x36   :  { %232 = vmatpush3.bf16.msra.mxu0 %v229_v12 }
  0x37   :  { %234 = vmatprep.subr.bf16.mxu0 %v233_v15 }
  0x3a   :  { %236 = vmatpush3.bf16.msra.mxu0 %v233_v15 }
  0x3b   :  { %238 = vmatprep.subr.bf16.mxu0 %v237_v18 }
  0x3e   :  { %240 = vmatpush3.bf16.msra.mxu0 %v237_v18 }
  0x3f   :  { %242 = vmatprep.subr.bf16.mxu0 %v241_v21 }
  0x42   :  { %244 = vmatpush3.bf16.msra.mxu0 %v241_v21 }
  0x43   :  { %246 = vmatprep.subr.bf16.mxu0 %v245_v24 }
  0x46   :  { %248 = vmatpush3.bf16.msra.mxu0 %v245_v24 }
  0x49   :  { %215 = vmatmul.mubr.f32.vlgmr.msra.gmra.mrb[0].mxu0 %v44_v25 }
 0x11c   :  { %v216_v27 = vpop.f32.mrb[0].mxu0 }
 0x11d   :  { %v140_v28 = vadd.f32 %v216_v27, %v163_v26  ;;  %v134_v29 = vpop.f32.mrb[1].mxu0 }
 0x11e   :  { %v135_v30 = vadd.f32 %v163_v26, %v134_v29 }
 0x11f   :  { %144 = vst [vmem:[#allocation7 + $0x8] sm:$0xff] %v140_v28 }
 0x120   :  { %143 = vst [vmem:[#allocation7] sm:$0xff] %v135_v30 }
 0x121   :  { %309 = shalt.err (!%p306_p6)
}
 0x122   :  { %s310_s2 = scalar_lea.hbm %s402_s3, 256 }
 0x123   :  { %p311_p7 = scmp.ne.s32.totalorder %s402_s3, %s310_s2  ;;  %p314_p8 = scmp.lt.u32.totalorder %s310_s2, %s402_s3 }
 0x125   :  { %p316_p9 = pnand %p314_p8, %p311_p7 }
 0x127   :  { %319 = shalt.err (!%p316_p9)
}
 0x128   :  { %156 = dma.vmem_to_hbm [thread:$0]  %s151_s12, 256, %s402_s3, [#allocation4], %s327_s22, %s327_s22, %s328_s23  }
 0x129   :  { %324 = dma.done.wait [#allocation4], 256  }
 0x12a   :  { %325 = vsyncadd [#allocation4], 4294967040 }
 0x12b   :  { %160 = vsyncpa [#allocation3], 1 }
 0x12c   :  { %161 = vsyncpa [#allocation6], 1 }
 0x12d   :  { %162 = vsyncpa [#allocation4], 1 }

</bundles_post_ra>
